<compile_context>
chip_gen: v5e
topology: v5e:2x2
jax: 0.10.0
libtpu: 0.0.40
codegen_flags: <defaults>
</compile_context>

<pallas_src>
import jax
import jax.numpy as jnp
from jax.experimental import pallas as pl
from jax.experimental.pallas import tpu as pltpu


def _model_kernel(w_ref, b_ref, x_ref, o_ref):
    # w_ref: (6,) f32 in SMEM, flattened torch weight, w_ref[o*2+k] == W[o, k]
    # b_ref: (3,) f32 in SMEM
    # x_ref: (6, L) VMEM block, row r = i*2 + k  (i indexes W's rows, k = in-feature)
    # o_ref: (9, L) VMEM block, row r = i*3 + o  (o = out-feature)
    w = [w_ref[r] for r in range(6)]      # 6 scalar loads from SMEM
    b = [b_ref[o] for o in range(3)]      # 3 scalar loads from SMEM

    for i in range(3):
        # v1[:, i, k] = x[:, i, k] + W[i, k]   (lane vectors, shape (1, L))
        a0 = x_ref[2 * i + 0:2 * i + 1, :] + w[2 * i + 0]
        a1 = x_ref[2 * i + 1:2 * i + 2, :] + w[2 * i + 1]
        for o in range(3):
            # y[:, i, o] = v1[:, i, 0]*W[o,0] + v1[:, i, 1]*W[o,1] + b[o]
            y = a0 * w[2 * o + 0] + a1 * w[2 * o + 1] + b[o]
            # out = y * |y|   (see TODO(synk) above)
            o_ref[3 * i + o:3 * i + o + 1, :] = y * jnp.abs(y)


def _round_up(a, m):
    return (a + m - 1) // m * m


def model_forward(x, weight, bias, *, block_lanes=1024):
    """x: (B, 3, 2) f32, weight: (3, 2) f32, bias: (3,) f32 -> (B, 3, 3) f32."""
    B = x.shape[0]

    # Batch-in-lanes layout: (B, 3, 2) -> (B, 6) -> (6, B), row = i*2+k.
    xt = x.astype(jnp.float32).reshape(B, 6).T                  # (6, B)

    # Pad the lane (batch) dimension to a multiple of the block width.
    blk = min(block_lanes, _round_up(B, 128))
    Bp = _round_up(B, blk)
    if Bp != B:
        xt = jnp.pad(xt, ((0, 0), (0, Bp - B)))

    w_flat = weight.astype(jnp.float32).reshape(6)              # row-major: [o, k]
    b_flat = bias.astype(jnp.float32).reshape(3)

    smem = pltpu.MemorySpace.SMEM
    out_t = pl.pallas_call(
        _model_kernel,
        out_shape=jax.ShapeDtypeStruct((9, Bp), jnp.float32),
        grid=(Bp // blk,),
        in_specs=[
            pl.BlockSpec(memory_space=smem),                    # weight (6,)
            pl.BlockSpec(memory_space=smem),                    # bias   (3,)
            pl.BlockSpec((6, blk), lambda j: (0, j)),           # x      (6, Bp)
        ],
        out_specs=pl.BlockSpec((9, blk), lambda j: (0, j)),     # out    (9, Bp)
        compiler_params=pltpu.CompilerParams(
            dimension_semantics=("parallel",),
        ),
    )(w_flat, b_flat, xt)

    # (9, Bp) -> (B, 9) -> (B, 3, 3)
    return out_t[:, :B].T.reshape(B, 3, 3)


def _reference(x, weight, bias):
    v1 = x + weight[None, :, :]
    y = jnp.einsum("bik,jk->bij", v1, weight) + bias
    return y * jnp.abs(y)


if __name__ == "__main__":
    key = jax.random.PRNGKey(0)
    kx, kw, kb = jax.random.split(key, 3)

    B = 2
    # Input consistent with the forward: last dim = 2 (in_features),
    # second-to-last = 3 so it broadcasts against the (3, 2) weight.
    x = jax.random.normal(kx, (B, 3, 2), dtype=jnp.float32)

    # Deterministic Linear(2, 3) parameters (torch-style uniform init bound).
    bound = 1.0 / jnp.sqrt(2.0)
    weight = jax.random.uniform(kw, (3, 2), jnp.float32, -bound, bound)
    bias = jax.random.uniform(kb, (3,), jnp.float32, -bound, bound)

    out = model_forward(x, weight, bias)
    out = jax.block_until_ready(out)

    ref = _reference(x, weight, bias)
    assert out.shape == (B, 3, 3)
    assert jnp.allclose(out, ref, atol=1e-5, rtol=1e-5)

    print("KERNEL_OK")
</pallas_src>

<mosaic_0001>
module attributes {stable_mosaic.version = 11 : i64} {
  func.func @_model_kernel(%arg0: i32, %arg1: memref<6xf32, #tpu.memory_space<smem>>, %arg2: memref<3xf32, #tpu.memory_space<smem>>, %arg3: memref<6x128xf32, #tpu.memory_space<vmem>>, %arg4: memref<9x128xf32, #tpu.memory_space<vmem>>) attributes {dimension_semantics = [#tpu.dimension_semantics<parallel>], iteration_bounds = array<i64: 1>, scalar_prefetch = 0 : i64, scratch_operands = 0 : i64, tpu.core_type = #tpu.core_type<tc>, window_params = [{transform_indices = @transform_0, window_bounds = array<i64: 6>}, {transform_indices = @transform_1, window_bounds = array<i64: 3>}, {transform_indices = @transform_2, window_bounds = array<i64: 6, 128>}, {transform_indices = @transform_3, window_bounds = array<i64: 9, 128>}]} {
    %c0 = arith.constant 0 : index
    %0 = memref.load %arg1[%c0] : memref<6xf32, #tpu.memory_space<smem>>
    %c1 = arith.constant 1 : index
    %1 = memref.load %arg1[%c1] : memref<6xf32, #tpu.memory_space<smem>>
    %c2 = arith.constant 2 : index
    %2 = memref.load %arg1[%c2] : memref<6xf32, #tpu.memory_space<smem>>
    %c3 = arith.constant 3 : index
    %3 = memref.load %arg1[%c3] : memref<6xf32, #tpu.memory_space<smem>>
    %c4 = arith.constant 4 : index
    %4 = memref.load %arg1[%c4] : memref<6xf32, #tpu.memory_space<smem>>
    %c5 = arith.constant 5 : index
    %5 = memref.load %arg1[%c5] : memref<6xf32, #tpu.memory_space<smem>>
    %c0_0 = arith.constant 0 : index
    %6 = memref.load %arg2[%c0_0] : memref<3xf32, #tpu.memory_space<smem>>
    %c1_1 = arith.constant 1 : index
    %7 = memref.load %arg2[%c1_1] : memref<3xf32, #tpu.memory_space<smem>>
    %c2_2 = arith.constant 2 : index
    %8 = memref.load %arg2[%c2_2] : memref<3xf32, #tpu.memory_space<smem>>
    %c0_3 = arith.constant 0 : index
    %c0_4 = arith.constant 0 : index
    %9 = vector.load %arg3[%c0_3, %c0_4] : memref<6x128xf32, #tpu.memory_space<vmem>>, vector<1x128xf32>
    %10 = vector.broadcast %0 : f32 to vector<1x128xf32>
    %11 = arith.addf %9, %10 : vector<1x128xf32>
    %c1_5 = arith.constant 1 : index
    %c0_6 = arith.constant 0 : index
    %12 = vector.load %arg3[%c1_5, %c0_6] : memref<6x128xf32, #tpu.memory_space<vmem>>, vector<1x128xf32>
    %13 = vector.broadcast %1 : f32 to vector<1x128xf32>
    %14 = arith.addf %12, %13 : vector<1x128xf32>
    %15 = vector.broadcast %0 : f32 to vector<1x128xf32>
    %16 = arith.mulf %11, %15 : vector<1x128xf32>
    %17 = vector.broadcast %1 : f32 to vector<1x128xf32>
    %18 = arith.mulf %14, %17 : vector<1x128xf32>
    %19 = arith.addf %16, %18 : vector<1x128xf32>
    %20 = vector.broadcast %6 : f32 to vector<1x128xf32>
    %21 = arith.addf %19, %20 : vector<1x128xf32>
    %22 = math.absf %21 : vector<1x128xf32>
    %23 = arith.mulf %21, %22 : vector<1x128xf32>
    %c0_7 = arith.constant 0 : index
    %c0_8 = arith.constant 0 : index
    %24 = vector.load %arg4[%c0_7, %c0_8] : memref<9x128xf32, #tpu.memory_space<vmem>>, vector<1x128xf32>
    tpu.vector_store %arg4[%c0_7, %c0_8], %23 {strides = array<i32>} : memref<9x128xf32, #tpu.memory_space<vmem>>, vector<1x128xf32>,
    %25 = vector.broadcast %2 : f32 to vector<1x128xf32>
    %26 = arith.mulf %11, %25 : vector<1x128xf32>
    %27 = vector.broadcast %3 : f32 to vector<1x128xf32>
    %28 = arith.mulf %14, %27 : vector<1x128xf32>
    %29 = arith.addf %26, %28 : vector<1x128xf32>
    %30 = vector.broadcast %7 : f32 to vector<1x128xf32>
    %31 = arith.addf %29, %30 : vector<1x128xf32>
    %32 = math.absf %31 : vector<1x128xf32>
    %33 = arith.mulf %31, %32 : vector<1x128xf32>
    %c1_9 = arith.constant 1 : index
    %c0_10 = arith.constant 0 : index
    %34 = vector.load %arg4[%c1_9, %c0_10] : memref<9x128xf32, #tpu.memory_space<vmem>>, vector<1x128xf32>
    tpu.vector_store %arg4[%c1_9, %c0_10], %33 {strides = array<i32>} : memref<9x128xf32, #tpu.memory_space<vmem>>, vector<1x128xf32>,
    %35 = vector.broadcast %4 : f32 to vector<1x128xf32>
    %36 = arith.mulf %11, %35 : vector<1x128xf32>
    %37 = vector.broadcast %5 : f32 to vector<1x128xf32>
    %38 = arith.mulf %14, %37 : vector<1x128xf32>
    %39 = arith.addf %36, %38 : vector<1x128xf32>
    %40 = vector.broadcast %8 : f32 to vector<1x128xf32>
    %41 = arith.addf %39, %40 : vector<1x128xf32>
    %42 = math.absf %41 : vector<1x128xf32>
    %43 = arith.mulf %41, %42 : vector<1x128xf32>
    %c2_11 = arith.constant 2 : index
    %c0_12 = arith.constant 0 : index
    %44 = vector.load %arg4[%c2_11, %c0_12] : memref<9x128xf32, #tpu.memory_space<vmem>>, vector<1x128xf32>
    tpu.vector_store %arg4[%c2_11, %c0_12], %43 {strides = array<i32>} : memref<9x128xf32, #tpu.memory_space<vmem>>, vector<1x128xf32>,
    %c2_13 = arith.constant 2 : index
    %c0_14 = arith.constant 0 : index
    %45 = vector.load %arg3[%c2_13, %c0_14] : memref<6x128xf32, #tpu.memory_space<vmem>>, vector<1x128xf32>
    %46 = vector.broadcast %2 : f32 to vector<1x128xf32>
    %47 = arith.addf %45, %46 : vector<1x128xf32>
    %c3_15 = arith.constant 3 : index
    %c0_16 = arith.constant 0 : index
    %48 = vector.load %arg3[%c3_15, %c0_16] : memref<6x128xf32, #tpu.memory_space<vmem>>, vector<1x128xf32>
    %49 = vector.broadcast %3 : f32 to vector<1x128xf32>
    %50 = arith.addf %48, %49 : vector<1x128xf32>
    %51 = vector.broadcast %0 : f32 to vector<1x128xf32>
    %52 = arith.mulf %47, %51 : vector<1x128xf32>
    %53 = vector.broadcast %1 : f32 to vector<1x128xf32>
    %54 = arith.mulf %50, %53 : vector<1x128xf32>
    %55 = arith.addf %52, %54 : vector<1x128xf32>
    %56 = vector.broadcast %6 : f32 to vector<1x128xf32>
    %57 = arith.addf %55, %56 : vector<1x128xf32>
    %58 = math.absf %57 : vector<1x128xf32>
    %59 = arith.mulf %57, %58 : vector<1x128xf32>
    %c3_17 = arith.constant 3 : index
    %c0_18 = arith.constant 0 : index
    %60 = vector.load %arg4[%c3_17, %c0_18] : memref<9x128xf32, #tpu.memory_space<vmem>>, vector<1x128xf32>
    tpu.vector_store %arg4[%c3_17, %c0_18], %59 {strides = array<i32>} : memref<9x128xf32, #tpu.memory_space<vmem>>, vector<1x128xf32>,
    %61 = vector.broadcast %2 : f32 to vector<1x128xf32>
    %62 = arith.mulf %47, %61 : vector<1x128xf32>
    %63 = vector.broadcast %3 : f32 to vector<1x128xf32>
    %64 = arith.mulf %50, %63 : vector<1x128xf32>
    %65 = arith.addf %62, %64 : vector<1x128xf32>
    %66 = vector.broadcast %7 : f32 to vector<1x128xf32>
    %67 = arith.addf %65, %66 : vector<1x128xf32>
    %68 = math.absf %67 : vector<1x128xf32>
    %69 = arith.mulf %67, %68 : vector<1x128xf32>
    %c4_19 = arith.constant 4 : index
    %c0_20 = arith.constant 0 : index
    %70 = vector.load %arg4[%c4_19, %c0_20] : memref<9x128xf32, #tpu.memory_space<vmem>>, vector<1x128xf32>
    tpu.vector_store %arg4[%c4_19, %c0_20], %69 {strides = array<i32>} : memref<9x128xf32, #tpu.memory_space<vmem>>, vector<1x128xf32>,
    %71 = vector.broadcast %4 : f32 to vector<1x128xf32>
    %72 = arith.mulf %47, %71 : vector<1x128xf32>
    %73 = vector.broadcast %5 : f32 to vector<1x128xf32>
    %74 = arith.mulf %50, %73 : vector<1x128xf32>
    %75 = arith.addf %72, %74 : vector<1x128xf32>
    %76 = vector.broadcast %8 : f32 to vector<1x128xf32>
    %77 = arith.addf %75, %76 : vector<1x128xf32>
    %78 = math.absf %77 : vector<1x128xf32>
    %79 = arith.mulf %77, %78 : vector<1x128xf32>
    %c5_21 = arith.constant 5 : index
    %c0_22 = arith.constant 0 : index
    %80 = vector.load %arg4[%c5_21, %c0_22] : memref<9x128xf32, #tpu.memory_space<vmem>>, vector<1x128xf32>
    tpu.vector_store %arg4[%c5_21, %c0_22], %79 {strides = array<i32>} : memref<9x128xf32, #tpu.memory_space<vmem>>, vector<1x128xf32>,
    %c4_23 = arith.constant 4 : index
    %c0_24 = arith.constant 0 : index
    %81 = vector.load %arg3[%c4_23, %c0_24] : memref<6x128xf32, #tpu.memory_space<vmem>>, vector<1x128xf32>
    %82 = vector.broadcast %4 : f32 to vector<1x128xf32>
    %83 = arith.addf %81, %82 : vector<1x128xf32>
    %c5_25 = arith.constant 5 : index
    %c0_26 = arith.constant 0 : index
    %84 = vector.load %arg3[%c5_25, %c0_26] : memref<6x128xf32, #tpu.memory_space<vmem>>, vector<1x128xf32>
    %85 = vector.broadcast %5 : f32 to vector<1x128xf32>
    %86 = arith.addf %84, %85 : vector<1x128xf32>
    %87 = vector.broadcast %0 : f32 to vector<1x128xf32>
    %88 = arith.mulf %83, %87 : vector<1x128xf32>
    %89 = vector.broadcast %1 : f32 to vector<1x128xf32>
    %90 = arith.mulf %86, %89 : vector<1x128xf32>
    %91 = arith.addf %88, %90 : vector<1x128xf32>
    %92 = vector.broadcast %6 : f32 to vector<1x128xf32>
    %93 = arith.addf %91, %92 : vector<1x128xf32>
    %94 = math.absf %93 : vector<1x128xf32>
    %95 = arith.mulf %93, %94 : vector<1x128xf32>
    %c6 = arith.constant 6 : index
    %c0_27 = arith.constant 0 : index
    %96 = vector.load %arg4[%c6, %c0_27] : memref<9x128xf32, #tpu.memory_space<vmem>>, vector<1x128xf32>
    tpu.vector_store %arg4[%c6, %c0_27], %95 {strides = array<i32>} : memref<9x128xf32, #tpu.memory_space<vmem>>, vector<1x128xf32>,
    %97 = vector.broadcast %2 : f32 to vector<1x128xf32>
    %98 = arith.mulf %83, %97 : vector<1x128xf32>
    %99 = vector.broadcast %3 : f32 to vector<1x128xf32>
    %100 = arith.mulf %86, %99 : vector<1x128xf32>
    %101 = arith.addf %98, %100 : vector<1x128xf32>
    %102 = vector.broadcast %7 : f32 to vector<1x128xf32>
    %103 = arith.addf %101, %102 : vector<1x128xf32>
    %104 = math.absf %103 : vector<1x128xf32>
    %105 = arith.mulf %103, %104 : vector<1x128xf32>
    %c7 = arith.constant 7 : index
    %c0_28 = arith.constant 0 : index
    %106 = vector.load %arg4[%c7, %c0_28] : memref<9x128xf32, #tpu.memory_space<vmem>>, vector<1x128xf32>
    tpu.vector_store %arg4[%c7, %c0_28], %105 {strides = array<i32>} : memref<9x128xf32, #tpu.memory_space<vmem>>, vector<1x128xf32>,
    %107 = vector.broadcast %4 : f32 to vector<1x128xf32>
    %108 = arith.mulf %83, %107 : vector<1x128xf32>
    %109 = vector.broadcast %5 : f32 to vector<1x128xf32>
    %110 = arith.mulf %86, %109 : vector<1x128xf32>
    %111 = arith.addf %108, %110 : vector<1x128xf32>
    %112 = vector.broadcast %8 : f32 to vector<1x128xf32>
    %113 = arith.addf %111, %112 : vector<1x128xf32>
    %114 = math.absf %113 : vector<1x128xf32>
    %115 = arith.mulf %113, %114 : vector<1x128xf32>
    %c8 = arith.constant 8 : index
    %c0_29 = arith.constant 0 : index
    %116 = vector.load %arg4[%c8, %c0_29] : memref<9x128xf32, #tpu.memory_space<vmem>>, vector<1x128xf32>
    tpu.vector_store %arg4[%c8, %c0_29], %115 {strides = array<i32>} : memref<9x128xf32, #tpu.memory_space<vmem>>, vector<1x128xf32>,
    return
  }
  func.func @transform_0(%arg0: i32) -> i32 {
    %c0_i32 = arith.constant 0 : i32
    %c0_i32_0 = arith.constant 0 : i32
    return %c0_i32 : i32
  }
  func.func @transform_1(%arg0: i32) -> i32 {
    %c0_i32 = arith.constant 0 : i32
    %c0_i32_0 = arith.constant 0 : i32
    return %c0_i32 : i32
  }
  func.func @transform_2(%arg0: i32) -> (i32, i32) {
    %c0_i32 = arith.constant 0 : i32
    %c0_i32_0 = arith.constant 0 : i32
    return %c0_i32, %arg0 : i32, i32
  }
  func.func @transform_3(%arg0: i32) -> (i32, i32) {
    %c0_i32 = arith.constant 0 : i32
    %c0_i32_0 = arith.constant 0 : i32
    return %c0_i32, %arg0 : i32, i32
  }
}

</mosaic_0001>

<bundles_post_ra>
// kernel: tpu_custom_call.1
= control target key start
LH: loop header
LB: loop body
LE: loop exit
PB: predicated region body
PF: predicated region fallthrough
CT: control target
= control target key end

     0   :  { %8 = vsyncpa [#allocation5], 0  ;;  %s299_s0 = inlined_call_operand.hbm [shape: f32[6], index: 0, kind: input, shape index: {}]   ;;  %s300_s1 = inlined_call_operand.hbm [shape: f32[3], index: 1, kind: input, shape index: {}]   ;;  %s301_s2 = inlined_call_operand.hbm [shape: f32[6,128], index: 2, kind: input, shape index: {}]   ;;  %s302_s3 = inlined_call_operand.hbm [shape: f32[9,128], index: 3, kind: output, shape index: {}]  }
   0x1   :  { %9 = vsyncpa [#allocation7], 0 }
   0x2   :  { %10 = vsyncpa [#allocation3], 0 }
   0x3   :  { %11 = vsyncpa [#allocation4], 0  ;;  %s17_s14 = sshll.u32 %s299_s0, 4  ;;  %s26_s17 = sshll.u32 %s300_s1, 4  ;;  %s18_s14 = int_to_ptr.hbm [resolvable:$true] %s17_s14  ;;  %s27_s17 = int_to_ptr.hbm [resolvable:$true] %s26_s17 }
   0x4   :  { %s261_s18 = smov [#allocation2]   ;;  %s262_s19 = smov [#allocation6]  }
   0x5   :  { %20 = dma.hbm_to_smem %s18_s14, 16, %s261_s18, [#allocation5]  }
   0x6   :  { %29 = dma.hbm_to_smem %s27_s17, 16, %s262_s19, [#allocation7]  }
   0x7   :  { %s35_s22 = sshll.u32 %s301_s2, 4  ;;  %s263_s23 = smov [#allocation8]   ;;  %s36_s22 = int_to_ptr.hbm [resolvable:$true] %s35_s22 }
   0x8   :  { %s37_s24 = sshll.u32 %s263_s23, 4  ;;  %s38_s24 = int_to_ptr.vmem [resolvable:$true] %s37_s24 }
   0x9   :  { %40 = dma.hbm_to_vmem [thread:$0]  %s36_s22, 128, %s38_s24, [#allocation3]  }
   0xa   :  { %253 = dma.done.wait [#allocation5], 16  }
   0xb   :  { %254 = vsyncadd [#allocation5], 4294967280 }
   0xc   :  { %255 = dma.done.wait [#allocation7], 16  }
   0xd   :  { %256 = vsyncadd [#allocation7], 4294967280 }
   0xe   :  { %257 = dma.done.wait [#allocation3], 128  }
   0xf   :  { %258 = vsyncadd [#allocation3], 4294967168 }
  0x10   :  { %53 = sfence }
  0x11   :  { %s54_s0 = sld [smem:[#allocation2]]  ;;  %v63_v0 = vld [vmem:[#allocation8] sm:$0x1]  ;;  %v66_v1 = vld [vmem:[#allocation8 + $0x1] sm:$0x1]  ;;  %s264_s4 = smov [#allocation9]  }
  0x12   :  { %s168_s1 = sld [smem:[#allocation2 + $0x1]]  ;;  %v97_v5 = vld [vmem:[#allocation8 + $0x2] sm:$0x1]  ;;  %v99_v7 = vld [vmem:[#allocation8 + $0x3] sm:$0x1]  ;;  %s151_s5 = sshll.u32 %s264_s4, 4  ;;  %s152_s5 = int_to_ptr.vmem [resolvable:$true] %s151_s5 }
  0x13   :  { %s60_s25 = sld [smem:[#allocation6]]  ;;  %v122_v26 = vld [vmem:[#allocation8 + $0x4] sm:$0x1]  ;;  %v124_v31 = vld [vmem:[#allocation8 + $0x5] sm:$0x1]  ;;  %s153_s8 = sshll.u32 %s302_s3, 4  ;;  %s154_s8 = int_to_ptr.hbm [resolvable:$true] %s153_s8 }
  0x14   :  { %s169_s26 = sld [smem:[#allocation2 + $0x2]]  ;;  %s265_s9 = smov 128  }
  0x15   :  { %s170_s27 = sld [smem:[#allocation2 + $0x3]]  ;;  %s266_s10 = smov 8  }
  0x16   :  { %s173_s2 = sld [smem:[#allocation6 + $0x1]] }
  0x17   :  { %v64_v2 = vstv %s54_s0  ;;  %s171_s28 = sld [smem:[#allocation2 + $0x4]] }
  0x18   :  { %v65_v3 = vadd.f32 %v64_v2, %v63_v0  ;;  %v67_v4 = vstv %s168_s1  ;;  %s172_s29 = sld [smem:[#allocation2 + $0x5]] }
  0x19   :  { %v68_v6 = vadd.f32 %v67_v4, %v66_v1  ;;  %s174_s30 = sld [smem:[#allocation6 + $0x2]]  ;;  %v72_v14 = vstv %s60_s25 }
  0x1a   :  { %v69_v8 = vmul.f32 %v65_v3, %v64_v2  ;;  %v77_v9 = vstv %s169_s26 }
  0x1b   :  { %v70_v10 = vmul.f32 %v68_v6, %v67_v4  ;;  %v78_v11 = vmul.f32 %v77_v9, %v65_v3  ;;  %v79_v12 = vstv %s170_s27  ;;  %v98_v13 = vadd.f32 %v97_v5, %v77_v9 }
  0x1c   :  { %v80_v15 = vmul.f32 %v79_v12, %v68_v6  ;;  %v82_v16 = vstv %s173_s2  ;;  %v100_v17 = vadd.f32 %v99_v7, %v79_v12 }
  0x1d   :  { %v71_v18 = vadd.f32 %v70_v10, %v69_v8  ;;  %v87_v19 = vstv %s171_s28  ;;  %v101_v20 = vmul.f32 %v98_v13, %v64_v2  ;;  %v108_v21 = vmul.f32 %v98_v13, %v77_v9 }
  0x1e   :  { %v81_v22 = vadd.f32 %v80_v15, %v78_v11  ;;  %v88_v23 = vmul.f32 %v87_v19, %v65_v3  ;;  %v89_v24 = vstv %s172_s29  ;;  %v102_v25 = vmul.f32 %v100_v17, %v67_v4 }
  0x1f   :  { %v73_v27 = vadd.f32 %v72_v14, %v71_v18  ;;  %v90_v28 = vmul.f32 %v89_v24, %v68_v6  ;;  %v92_v29 = vstv %s174_s30  ;;  %v109_v30 = vmul.f32 %v100_v17, %v79_v12 }
  0x20   :  { %v83_v32 = vadd.f32 %v82_v16, %v81_v22  ;;  %v103_v33 = vadd.f32 %v102_v25, %v101_v20  ;;  %v115_v34 = vmul.f32 %v98_v13, %v87_v19  ;;  %v116_v35 = vmul.f32 %v100_v17, %v89_v24 }
  0x21   :  { %v74_v36 = vand.u32 2147483647, %v73_v27  ;;  %v91_v37 = vadd.f32 %v90_v28, %v88_v23  ;;  %v110_v38 = vadd.f32 %v109_v30, %v108_v21  ;;  %v123_v39 = vadd.f32 %v122_v26, %v87_v19 }
  0x22   :  { %v84_v40 = vand.u32 2147483647, %v83_v32  ;;  %v104_v41 = vadd.f32 %v103_v33, %v72_v14  ;;  %v117_v42 = vadd.f32 %v116_v35, %v115_v34  ;;  %v125_v43 = vadd.f32 %v124_v31, %v89_v24 }
  0x23   :  { %v75_v44 = vmul.f32 %v74_v36, %v73_v27  ;;  %v93_v45 = vadd.f32 %v92_v29, %v91_v37  ;;  %v111_v46 = vadd.f32 %v110_v38, %v82_v16  ;;  %v126_v47 = vmul.f32 %v123_v39, %v64_v2 }
  0x24   :  { %v85_v48 = vmul.f32 %v84_v40, %v83_v32  ;;  %v105_v49 = vand.u32 2147483647, %v104_v41  ;;  %v118_v50 = vadd.f32 %v117_v42, %v92_v29  ;;  %v127_v51 = vmul.f32 %v125_v43, %v67_v4 }
  0x25   :  { %76 = vst [vmem:[#allocation9] sm:$0x1] %v75_v44  ;;  %v94_v52 = vand.u32 2147483647, %v93_v45  ;;  %v112_v53 = vand.u32 2147483647, %v111_v46  ;;  %v133_v54 = vmul.f32 %v123_v39, %v77_v9  ;;  %v134_v55 = vmul.f32 %v125_v43, %v79_v12 }
  0x26   :  { %86 = vst [vmem:[#allocation9 + $0x1] sm:$0x1] %v85_v48  ;;  %v106_v56 = vmul.f32 %v105_v49, %v104_v41  ;;  %v119_v57 = vand.u32 2147483647, %v118_v50  ;;  %v128_v58 = vadd.f32 %v127_v51, %v126_v47  ;;  %v140_v59 = vmul.f32 %v123_v39, %v87_v19 }
  0x27   :  { %v95_v60 = vmul.f32 %v94_v52, %v93_v45  ;;  %v113_v61 = vmul.f32 %v112_v53, %v111_v46  ;;  %v135_v62 = vadd.f32 %v134_v55, %v133_v54  ;;  %v141_v63 = vmul.f32 %v125_v43, %v89_v24 }
  0x28   :  { %107 = vst [vmem:[#allocation9 + $0x3] sm:$0x1] %v106_v56  ;;  %v120_v0 = vmul.f32 %v119_v57, %v118_v50  ;;  %v129_v1 = vadd.f32 %v128_v58, %v72_v14 }
  0x29   :  { %96 = vst [vmem:[#allocation9 + $0x2] sm:$0x1] %v95_v60  ;;  %v136_v2 = vadd.f32 %v135_v62, %v82_v16  ;;  %v142_v3 = vadd.f32 %v141_v63, %v140_v59 }
  0x2a   :  { %114 = vst [vmem:[#allocation9 + $0x4] sm:$0x1] %v113_v61  ;;  %v130_v4 = vand.u32 2147483647, %v129_v1 }
  0x2b   :  { %121 = vst [vmem:[#allocation9 + $0x5] sm:$0x1] %v120_v0  ;;  %v137_v5 = vand.u32 2147483647, %v136_v2  ;;  %v143_v6 = vadd.f32 %v142_v3, %v92_v29 }
  0x2c   :  { %v131_v7 = vmul.f32 %v130_v4, %v129_v1 }
  0x2d   :  { %v138_v8 = vmul.f32 %v137_v5, %v136_v2  ;;  %v144_v9 = vand.u32 2147483647, %v143_v6 }
  0x2e   :  { %132 = vst [vmem:[#allocation9 + $0x6] sm:$0x1] %v131_v7 }
  0x2f   :  { %139 = vst [vmem:[#allocation9 + $0x7] sm:$0x1] %v138_v8  ;;  %v145_v10 = vmul.f32 %v144_v9, %v143_v6 }
  0x31   :  { %146 = vst [vmem:[#allocation9 + $0x8] sm:$0x1] %v145_v10 }
  0x32   :  { %159 = dma.vmem_to_hbm [thread:$0]  %s152_s5, 256, %s154_s8, [#allocation4], %s265_s9, %s265_s9, %s266_s10  }
  0x33   :  { %259 = dma.done.wait [#allocation4], 256  }
  0x34   :  { %260 = vsyncadd [#allocation4], 4294967040 }
  0x35   :  { %164 = vsyncpa [#allocation3], 1 }
  0x36   :  { %165 = vsyncpa [#allocation4], 1 }
  0x37   :  { %166 = vsyncpa [#allocation5], 1 }
  0x38   :  { %167 = vsyncpa [#allocation7], 1 }

</bundles_post_ra>
